<compile_context>
chip_gen: v7x
topology: tpu7x:2x2x1
jax: 0.10.0
libtpu: 0.0.40
codegen_flags: <defaults>
</compile_context>

<pallas_src>
import jax
import jax.numpy as jnp
from jax.experimental import pallas as pl
from jax.experimental.pallas import tpu as pltpu


def _tpu_plan():
    """Generation-aware tiling constants (lane target, TC count, VMEM limit)."""
    kind = ""
    try:
        kind = jax.devices()[0].device_kind.lower()
    except Exception:
        pass
    if "v7" in kind or "7x" in kind:
        return dict(lane_target=256, num_cores=2, vmem_limit=48 * 1024 * 1024)
    if "v6" in kind:
        return dict(lane_target=256, num_cores=1, vmem_limit=96 * 1024 * 1024)
    if "v5" in kind:
        return dict(lane_target=128, num_cores=1, vmem_limit=96 * 1024 * 1024)
    # Unknown generation: settings that are safe on every current TPU.
    return dict(lane_target=256, num_cores=1, vmem_limit=48 * 1024 * 1024)


def pack_spectral_conv1d_params(weights1, *, lane_target=None):
    """One-time packing of SpectralConv1d weights for the Pallas kernel.

    weights1: (Cin, Cout, modes1) complex.  Returns a dict with the bf16
    block-diagonal weight tensor (NG, G*2Cin, G*2Cout) plus layout metadata.
    Call once at parameter-init time; reuse across forward passes.
    """
    if lane_target is None:
        lane_target = _tpu_plan()["lane_target"]
    Cin, Cout, M = weights1.shape
    G = max(1, min(M, lane_target // (2 * Cin)))   # modes per block-diag group
    NG = pl.cdiv(M, G)                             # number of groups
    Mp = NG * G                                    # modes padded to full groups

    wr = jnp.transpose(jnp.real(weights1), (2, 0, 1)).astype(jnp.float32)  # (M,Cin,Cout)
    wi = jnp.transpose(jnp.imag(weights1), (2, 0, 1)).astype(jnp.float32)
    # Per-mode real block [[Wr, Wi], [-Wi, Wr]]  -> (M, 2Cin, 2Cout)
    w_top = jnp.concatenate([wr, wi], axis=-1)
    w_bot = jnp.concatenate([-wi, wr], axis=-1)
    w_mode = jnp.concatenate([w_top, w_bot], axis=1).astype(jnp.bfloat16)
    w_mode = jnp.pad(w_mode, ((0, Mp - M), (0, 0), (0, 0)))                # zero modes

    # Block-diagonal packing: G modes per (G*2Cin, G*2Cout) tile.
    w_grp = w_mode.reshape(NG, G, 2 * Cin, 2 * Cout)
    eye = jnp.eye(G, dtype=w_grp.dtype)
    w_blk = w_grp[:, :, :, None, :] * eye[None, :, None, :, None]          # (NG,G,2Cin,G,2Cout)
    w_blk = w_blk.reshape(NG, G * 2 * Cin, G * 2 * Cout)

    return dict(w_blk=w_blk, in_channels=Cin, out_channels=Cout,
                modes1=M, group=G, num_groups=NG)


def _spectral_kernel(x_ref, w_ref, o_ref):
    # x: (Gt, B, Kg) bf16 | w: (Gt, Kg, Ng) bf16 | o: (B, Gt, Ng) bf16
    # One large 2D MXU dot per block-diagonal group; f32 accumulation,
    # bf16 batch-major store.
    for j in range(x_ref.shape[0]):
        o_ref[:, j, :] = jnp.dot(
            x_ref[j], w_ref[j], preferred_element_type=jnp.float32
        ).astype(o_ref.dtype)


def _spectral_matmul(xs, w_blk, plan):
    """xs: (NG, B, Kg) bf16, w_blk: (NG, Kg, Ng) bf16 -> (B, NGp, Ng) bf16."""
    NG, B, Kg = xs.shape
    Ng = w_blk.shape[-1]

    # Groups per grid step: target one step per TensorCore, bounded by VMEM.
    budget = int(plan["vmem_limit"] * 0.6)
    per_group = 2 * 2 * (B * Kg + Kg * Ng + B * Ng)   # bf16, double-buffered
    gt_vmem = max(1, budget // per_group)
    gt = max(1, min(NG, pl.cdiv(NG, plan["num_cores"]), gt_vmem))
    if gt < NG and gt % 8 != 0:
        # Keep the batch-major output BlockSpec legal (sublane dim multiple of 8).
        gt = min(NG, ((gt + 7) // 8) * 8)
    n_steps = pl.cdiv(NG, gt)
    NGp = n_steps * gt
    if NGp != NG:
        xs = jnp.pad(xs, ((0, NGp - NG), (0, 0), (0, 0)))
        w_blk = jnp.pad(w_blk, ((0, NGp - NG), (0, 0), (0, 0)))

    cost = pl.CostEstimate(
        flops=2 * B * NGp * Kg * Ng,
        transcendentals=0,
        bytes_accessed=2 * (NGp * B * Kg + NGp * Kg * Ng + B * NGp * Ng),
    )
    return pl.pallas_call(
        _spectral_kernel,
        out_shape=jax.ShapeDtypeStruct((B, NGp, Ng), jnp.bfloat16),
        grid=(n_steps,),
        in_specs=[
            pl.BlockSpec((gt, B, Kg), lambda s: (s, 0, 0)),
            pl.BlockSpec((gt, Kg, Ng), lambda s: (s, 0, 0)),
        ],
        out_specs=pl.BlockSpec((B, gt, Ng), lambda s: (0, s, 0)),
        compiler_params=pltpu.CompilerParams(
            dimension_semantics=("parallel",),
            vmem_limit_bytes=plan["vmem_limit"],
        ),
        cost_estimate=cost,
    )(xs, w_blk)


def spectral_conv1d(x, packed):
    """Forward pass of SpectralConv1d with pre-packed weights.

    x: (B, Cin, N) float32, packed: dict from pack_spectral_conv1d_params.
    Returns (B, Cout, N) float32.
    """
    plan = _tpu_plan()
    B, Cin, N = x.shape
    Cout = packed["out_channels"]
    M = packed["modes1"]
    G = packed["group"]
    NG = packed["num_groups"]
    Mp = NG * G
    assert Cin == packed["in_channels"], (Cin, packed["in_channels"])
    assert M <= N // 2 + 1, f"modes1={M} exceeds rfft length {N // 2 + 1}"

    # FFT glue (no Pallas FFT primitive).
    x_ft = jnp.fft.rfft(x, axis=-1)                 # (B, Cin, N//2+1) complex64
    x_m = x_ft[:, :, :M]                            # (B, Cin, M)

    # Activations: [Re | Im] along channels, cast to bf16 BEFORE padding, then
    # regrouped so K = (mode-within-group, 2*Cin) matches the block-diag weights.
    xr = jnp.real(x_m).astype(jnp.bfloat16)
    xi = jnp.imag(x_m).astype(jnp.bfloat16)
    xri = jnp.concatenate([xr, xi], axis=1)         # (B, 2Cin, M)
    xri = jnp.pad(xri, ((0, 0), (0, 0), (0, Mp - M)))
    xs = jnp.transpose(xri, (2, 0, 1))              # (Mp, B, 2Cin)
    xs = xs.reshape(NG, G, B, 2 * Cin)
    xs = jnp.transpose(xs, (0, 2, 1, 3)).reshape(NG, B, G * 2 * Cin)

    out = _spectral_matmul(xs, packed["w_blk"], plan)      # (B, NGp, G*2Cout) bf16

    out = out.reshape(B, -1, 2 * Cout)[:, :M, :]           # (B, M, 2Cout) compact
    out_c = jax.lax.complex(out[..., :Cout].astype(jnp.float32),
                            out[..., Cout:].astype(jnp.float32))   # (B, M, Cout)
    out_c = jnp.transpose(out_c, (0, 2, 1))                        # (B, Cout, M) small

    out_ft = jnp.zeros((B, Cout, N // 2 + 1), dtype=jnp.complex64)
    out_ft = out_ft.at[:, :, :M].set(out_c)
    return jnp.fft.irfft(out_ft, n=N, axis=-1)             # (B, Cout, N) float32


def spectral_conv1d_reference(x, weights1, modes1):
    """Plain-JAX reference matching the PyTorch module (complex64 throughout)."""
    B, Cin, N = x.shape
    Cout = weights1.shape[1]
    x_ft = jnp.fft.rfft(x, axis=-1)
    prod = jnp.einsum("bix,iox->box", x_ft[:, :, :modes1], weights1)
    out_ft = jnp.zeros((B, Cout, N // 2 + 1), dtype=jnp.complex64)
    out_ft = out_ft.at[:, :, :modes1].set(prod)
    return jnp.fft.irfft(out_ft, n=N, axis=-1)


if __name__ == "__main__":
    B, Cin, Cout, N, modes1 = 2, 4, 4, 16, 8

    key = jax.random.PRNGKey(0)
    kx, kwr, kwi = jax.random.split(key, 3)

    x = jax.random.normal(kx, (B, Cin, N), dtype=jnp.float32)

    # weights1 = scale * rand(Cin, Cout, modes1, dtype=cfloat)
    # (torch.rand on cfloat draws real and imag parts independently from U[0,1))
    scale = 1.0 / (Cin * Cout)
    w_re = scale * jax.random.uniform(kwr, (Cin, Cout, modes1), dtype=jnp.float32)
    w_im = scale * jax.random.uniform(kwi, (Cin, Cout, modes1), dtype=jnp.float32)
    weights1 = (w_re + 1j * w_im).astype(jnp.complex64)

    # Pack weights ONCE (parameter-init time), reuse for every forward call.
    packed = pack_spectral_conv1d_params(weights1)

    y = jax.block_until_ready(spectral_conv1d(x, packed))
    assert y.shape == (B, Cout, N), y.shape
    assert y.dtype == jnp.float32, y.dtype

    # Tolerance check vs. the complex64 reference (bf16 MXU operands -> small drift).
    y_ref = jax.block_until_ready(spectral_conv1d_reference(x, weights1, modes1))
    err = float(jnp.max(jnp.abs(y - y_ref)))
    ref_mag = float(jnp.max(jnp.abs(y_ref)))
    assert err <= 5e-2 * ref_mag + 1e-6, (err, ref_mag)

    print("KERNEL_OK")
</pallas_src>

<mosaic_0001>
module attributes {stable_mosaic.version = 11 : i64} {
  func.func @_spectral_kernel(%arg0: i32, %arg1: memref<1x2x64xbf16, #tpu.memory_space<vmem>>, %arg2: memref<1x64x64xbf16, #tpu.memory_space<vmem>>, %arg3: memref<2x1x64xbf16, #tpu.memory_space<vmem>>) attributes {dimension_semantics = [#tpu.dimension_semantics<parallel>], iteration_bounds = array<i64: 1>, scalar_prefetch = 0 : i64, scratch_operands = 0 : i64, tpu.core_type = #tpu.core_type<tc>, window_params = [{transform_indices = @transform_0, window_bounds = array<i64: 1, 2, 64>}, {transform_indices = @transform_1, window_bounds = array<i64: 1, 64, 64>}, {transform_indices = @transform_2, window_bounds = array<i64: 2, 1, 64>}]} {
    %c0 = arith.constant 0 : index
    %c0_0 = arith.constant 0 : index
    %c0_1 = arith.constant 0 : index
    %0 = vector.load %arg1[%c0, %c0_0, %c0_1] : memref<1x2x64xbf16, #tpu.memory_space<vmem>>, vector<1x2x64xbf16>
    %1 = vector.shape_cast %0 : vector<1x2x64xbf16> to vector<2x64xbf16>
    %c0_2 = arith.constant 0 : index
    %c0_3 = arith.constant 0 : index
    %c0_4 = arith.constant 0 : index
    %2 = vector.load %arg2[%c0_2, %c0_3, %c0_4] : memref<1x64x64xbf16, #tpu.memory_space<vmem>>, vector<1x64x64xbf16>
    %3 = vector.shape_cast %2 : vector<1x64x64xbf16> to vector<64x64xbf16>
    %cst = arith.constant dense<0.000000e+00> : vector<2x64xf32>
    %4 = tpu.matmul %1, %3, %cst {dimension_numbers = #tpu.dot_dimension_numbers<[1], [0], [0], [1], [0, 0, 1, 1], [], []>} : vector<2x64xbf16>, vector<64x64xbf16>, vector<2x64xf32> -> vector<2x64xf32>
    %5 = arith.truncf %4 : vector<2x64xf32> to vector<2x64xbf16>
    %c0_5 = arith.constant 0 : index
    %c0_6 = arith.constant 0 : index
    %c0_7 = arith.constant 0 : index
    %6 = vector.load %arg3[%c0_5, %c0_6, %c0_7] : memref<2x1x64xbf16, #tpu.memory_space<vmem>>, vector<2x1x64xbf16>
    %7 = vector.shape_cast %6 : vector<2x1x64xbf16> to vector<2x64xbf16>
    %8 = vector.shape_cast %5 : vector<2x64xbf16> to vector<2x1x64xbf16>
    tpu.vector_store %arg3[%c0_5, %c0_6, %c0_7], %8 {strides = array<i32>} : memref<2x1x64xbf16, #tpu.memory_space<vmem>>, vector<2x1x64xbf16>,
    return
  }
  func.func @transform_0(%arg0: i32) -> (i32, i32, i32) {
    %c0_i32 = arith.constant 0 : i32
    %c0_i32_0 = arith.constant 0 : i32
    %c0_i32_1 = arith.constant 0 : i32
    return %arg0, %c0_i32, %c0_i32_0 : i32, i32, i32
  }
  func.func @transform_1(%arg0: i32) -> (i32, i32, i32) {
    %c0_i32 = arith.constant 0 : i32
    %c0_i32_0 = arith.constant 0 : i32
    %c0_i32_1 = arith.constant 0 : i32
    return %arg0, %c0_i32, %c0_i32_0 : i32, i32, i32
  }
  func.func @transform_2(%arg0: i32) -> (i32, i32, i32) {
    %c0_i32 = arith.constant 0 : i32
    %c0_i32_0 = arith.constant 0 : i32
    %c0_i32_1 = arith.constant 0 : i32
    return %c0_i32, %arg0, %c0_i32_0 : i32, i32, i32
  }
}

</mosaic_0001>

<bundles_post_ra>
// kernel: tpu_custom_call.1
= control target key start
LH: loop header
LB: loop body
LE: loop exit
PB: predicated region body
PF: predicated region fallthrough
CT: control target
= control target key end

     0   :  { %7 = vsyncpa [#allocation3], 0  ;;  %s299_s0 = inlined_call_operand.hbm [shape: bf16[1,2,64], index: 0, kind: input, shape index: {}]   ;;  %s300_s1 = inlined_call_operand.hbm [shape: bf16[1,64,64], index: 1, kind: input, shape index: {}]   ;;  %s301_s2 = inlined_call_operand.vmem [shape: bf16[2,1,64], index: 2, kind: output, shape index: {}]  }
   0x1   :  { %8 = vsyncpa [#allocation5], 0  ;;  %s234_s9 = smov [#allocation2]   ;;  %s235_s11 = smov [#allocation4]  }
   0x2   :  { %s15_s10 = sshll.u32 %s234_s9, 4  ;;  %s24_s12 = sshll.u32 %s235_s11, 4  ;;  %s16_s10 = int_to_ptr.vmem [resolvable:$true] %s15_s10  ;;  %s256_s12 = int_to_ptr.vmem [resolvable:$true] %s24_s12 }
   0x3   :  { %s186_s15 = scalar_lea.hbm %s299_s0, 16 }
   0x4   :  { %p187_p0 = scmp.ne.s32.totalorder %s299_s0, %s186_s15  ;;  %p190_p1 = scmp.lt.u32.totalorder %s186_s15, %s299_s0 }
   0x6   :  { %p192_p2 = pnand %p190_p1, %p187_p0 }
   0x8   :  { %195 = shalt.err (!%p192_p2)
}
   0x9   :  { %s196_s20 = scalar_lea.vmem %s16_s10, 16  ;;  %s200_s21 = scalar_lea.vmem %s16_s10, 32 }
   0xa   :  { %p197_p3 = scmp.ne.s32.totalorder %s16_s10, %s196_s20  ;;  %p201_p4 = scmp.lt.s32.totalorder %s16_s10, %s16_s10 }
   0xb   :  { %p202_p5 = scmp.lt.s32.totalorder %s200_s21, %s196_s20 }
   0xd   :  { %p203_p6 = por %p202_p5, %p201_p4 }
   0xf   :  { %p204_p7 = pnand %p203_p6, %p197_p3 }
  0x11   :  { %207 = shalt.err (!%p204_p7)
}
  0x12   :  { %18 = dma.hbm_to_vmem [thread:$0]  %s299_s0, 16, %s16_s10, [#allocation3]  }
  0x13   :  { %s208_s26 = scalar_lea.hbm %s300_s1, 512 }
  0x14   :  { %p209_p8 = scmp.ne.s32.totalorder %s300_s1, %s208_s26  ;;  %p212_p9 = scmp.lt.u32.totalorder %s208_s26, %s300_s1 }
  0x16   :  { %p214_p10 = pnand %p212_p9, %p209_p8 }
  0x18   :  { %217 = shalt.err (!%p214_p10)
}
  0x19   :  { %s218_s3 = scalar_lea.vmem %s256_s12, 512  ;;  %p223_p12 = scmp.lt.s32.totalorder %s256_s12, %s256_s12 }
  0x1a   :  { %p219_p11 = scmp.ne.s32.totalorder %s256_s12, %s218_s3  ;;  %p224_p13 = scmp.lt.s32.totalorder %s218_s3, %s218_s3 }
  0x1c   :  { %p225_p0 = por %p224_p13, %p223_p12 }
  0x1e   :  { %p226_p1 = pnand %p225_p0, %p219_p11 }
  0x20   :  { %229 = shalt.err (!%p226_p1)
}
  0x21   :  { %s236_s0 = smov 64   ;;  %s237_s4 = smov 4  }
  0x22   :  { %30 = dma.hbm_to_vmem [thread:$0]  %s300_s1, 512, %s256_s12, [#allocation5], %s236_s0, %s236_s0, %s237_s4  }
  0x23   :  { %230 = dma.done.wait [#allocation3], 16  }
  0x24   :  { %231 = vsyncadd [#allocation3], 4294967280 }
  0x25   :  { %232 = dma.done.wait [#allocation5], 512  }
  0x26   :  { %233 = vsyncadd [#allocation5], 4294966784  ;;  %v238_v0 = vmov 0.0   ;;  %vm239_vm0 = vmmov 0   ;;  %v182_v1 = vld [vmem:[#allocation4] sm:$0xff]   ;;  %v183_v2 = vld [vmem:[#allocation4 + $0x8] sm:$0xff]   ;;  %v120_v8 = vlaneseq }
  0x27   :  { %163 = vmatprep.subr.bf16.mxu0 %v238_v0  ;;  %171 = vmatprep.mubr.msk.bf16.mxu0 %vm239_vm0, %v238_v0  ;;  %v184_v3 = vld [vmem:[#allocation4 + $0x10] sm:$0xff]   ;;  %v185_v4 = vld [vmem:[#allocation4 + $0x18] sm:$0xff]   ;;  %vm71_vm1 = vcmask 523264   ;;  %v240_v6 = vmov 1966171168   ;;  %vm137_vm2 = vcmask 516096  }
  0x28   :  { %164 = vmatpush3.bf16.msra.mxu0 %v182_v1  ;;  %v38_v5 = vld [vmem:[#allocation2] sm:$0x1]  ;;  %v118_v7 = vunpack.c.l.s4 %v240_v6  ;;  %v121_v10 = vshrl.u32 %v120_v8, 7  ;;  %vm138_vm3 = vsmask.f32 256 }
  0x29   :  { %165 = vmatprep.subr.bf16.mxu0 %v238_v0  ;;  %vm139_vm4 = vmand %vm137_vm2, %vm138_vm3  ;;  %v140_v19 = vld [vmem:[%s301_s2] sm:$0x1]  ;;  %v143_v22 = vld [vmem:[%s301_s2 + $0x1] sm:$0x1] }
  0x2a   :  { %v119_v9 = vunpack.c.0.s8 %v118_v7 }
  0x2c   :  { %166 = vmatpush3.bf16.msra.mxu0 %v183_v2  ;;  %v122_v11 = vsub.s32 %v119_v9, %v121_v10 }
  0x2d   :  { %167 = vmatprep.subr.bf16.mxu0 %v238_v0 }
  0x30   :  { %168 = vmatpush3.bf16.msra.mxu0 %v184_v3 }
  0x31   :  { %169 = vmatprep.subr.bf16.mxu0 %v238_v0 }
  0x34   :  { %170 = vmatpush3.bf16.msra.mxu0 %v185_v4 }
  0x37   :  { %172 = vmatmul.mubr.msk.bf16.vlgmr.msra.gmra.mrb[0].mxu0 %vm71_vm1, %v38_v5 }
 0x10a   :  { %v109_v12 = vpop.f32.mrb[0].mxu0 }
 0x10b   :  { %v115_v13 = vpack.c.bf16 %v109_v12, %v109_v12  ;;  %v173_v14 = vpop.f32.mrb[1].mxu0 }
 0x10c   :  { %v112_v15 = vpop.f32.mrb[2].mxu0 }
 0x10d   :  { %v123_v16 = vrot.slane %v115_v13, %v122_v11  ;;  %v174_v17 = vpop.f32.mrb[3].mxu0 }
 0x10f   :  { %v130_v18 = vrot.slane %v123_v16, %v122_v11 }
 0x111   :  { %v132_v20 = vunpack.i.h.s16 %v130_v18  ;;  %v157_v21 = vpack.i.b16 %v130_v18, %v130_v18 }
 0x113   :  { %v134_v23 = vpack.i.b16 %v132_v20, %v132_v20  ;;  %v141_v24 = vsel %vm139_vm4, %v157_v21, %v140_v19 }
 0x114   :  { %142 = vst [vmem:[%s301_s2] sm:$0x1] %v141_v24 }
 0x115   :  { %v144_v25 = vsel %vm139_vm4, %v134_v23, %v143_v22 }
 0x116   :  { %145 = vst [vmem:[%s301_s2 + $0x1] sm:$0x1] %v144_v25 }
 0x117   :  { %150 = vsyncpa [#allocation3], 1 }
 0x118   :  { %151 = vsyncpa [#allocation5], 1 }

</bundles_post_ra>
